<compile_context>
chip_gen: v6e
topology: v6e:2x2x1
jax: 0.10.0
libtpu: 0.0.40
codegen_flags: <defaults>
</compile_context>

<pallas_src>
import jax
import jax.numpy as jnp
from jax import lax
from jax.experimental import pallas as pl
from jax.experimental.pallas import tpu as pltpu


def _round_up(n, m):
    return ((n + m - 1) // m) * m


def _critic_kernel(zh_ref, state0_ref, wzh_ref, whh_ref, vec_ref, wout_ref,
                   probs_ref, misc_ref):
    f32 = jnp.float32
    T = zh_ref.shape[0]
    R = whh_ref.shape[0]
    W = vec_ref.shape[1]

    # ---- packed small vectors (one lane-dense slab, sliced at lane offset 0)
    b_fused = vec_ref[0:1, 0:4 * R]      # (1, 4R) fused proj/LSTM bias
    gamma = vec_ref[1:2, 0:R]            # (1, R)
    beta = vec_ref[2:3, 0:R]             # (1, R)
    b_out = vec_ref[3:4, :]              # (1, W)  zero-padded past B
    bins = vec_ref[4:5, :]               # (1, W)  zero-padded past B

    # ---- input-dependent half of all LSTM gates, all timesteps, one MXU push
    gx = jnp.dot(zh_ref[...], wzh_ref[...],
                 preferred_element_type=f32) + b_fused          # (T, 4R)

    whh = whh_ref[...]                                          # (R, 4R) lane-dense

    # static lane mask selecting the "g" gate segment (tanh); others sigmoid
    lane = lax.broadcasted_iota(jnp.int32, (1, 4 * R), 1)
    g_mask = (lane >= 2 * R) & (lane < 3 * R)

    h_t = state0_ref[0:1, :]             # (1, R)
    c_t = state0_ref[1:2, :]             # (1, R)

    # ---- LSTM recurrence (1 layer, batch == 1); static unroll, values only
    hs = []
    for t in range(T):
        gates = gx[t:t + 1, :] + jnp.dot(h_t, whh,
                                         preferred_element_type=f32)  # (1, 4R)
        act = jnp.where(g_mask, jnp.tanh(gates), jax.nn.sigmoid(gates))
        i_g = act[:, 0:R]
        f_g = act[:, R:2 * R]
        g_g = act[:, 2 * R:3 * R]
        o_g = act[:, 3 * R:4 * R]
        c_t = f_g * c_t + i_g * g_g
        h_t = o_g * jnp.tanh(c_t)
        hs.append(h_t)

    lstm_out = jnp.concatenate(hs, axis=0)                      # (T, R)

    # ---- BatchNorm1d(recurrent_size), training-mode batch statistics
    # TODO(synk): running_mean/running_var are neither consumed nor updated
    # (eval-mode BN would differ); training-mode batch stats are used as in
    # the reference forward under module.train().
    mean = jnp.mean(lstm_out, axis=0, keepdims=True)
    var = jnp.mean((lstm_out - mean) ** 2, axis=0, keepdims=True)
    x_hat = (lstm_out - mean) * lax.rsqrt(var + 1e-5)
    act_bn = jnp.maximum(x_hat * gamma + beta, 0.0)             # BN + ReLU

    # ---- output head (MLP depth=1 -> single Linear), zero-padded to W lanes
    # TODO(synk): reference `MLP` class not provided; assumed depth=1 == one Linear.
    logits = jnp.dot(act_bn, wout_ref[...],
                     preferred_element_type=f32) + b_out        # (T, W)

    # ---- softmax over dim 0 (time), exact division for accuracy
    m = jnp.max(logits, axis=0, keepdims=True)
    e = jnp.exp(logits - m)
    denom = jnp.sum(e, axis=0, keepdims=True)
    probs = e / denom
    probs_ref[...] = probs                                      # lane-dense store

    # ---- vt = sum_dim0(probs * bin_centers)
    # TODO(synk): PyTorch does this reduction in float64; no f64 on TPU Pallas -> f32.
    vt = jnp.sum(probs * bins, axis=0, keepdims=True)           # (1, W)

    # ---- pack vt / h_n / c_n into one lane-dense (8, W) output slab
    pad = jnp.zeros((1, W - R), f32)
    misc = jnp.concatenate(
        [vt,
         jnp.concatenate([h_t, pad], axis=1),
         jnp.concatenate([c_t, pad], axis=1),
         jnp.zeros((5, W), f32)],
        axis=0)                                                 # (8, W)
    misc_ref[...] = misc


def prepare_critic_params(params, num_codes, num_latent, recurrent_size):
    """One-time host-side folding.  Call once per parameter set, NOT per forward."""
    f32 = jnp.float32
    Z = num_codes * num_latent
    R = recurrent_size
    B = params["w_out"].shape[1]
    W = _round_up(max(4 * R, B), 128)          # lane-dense working width

    w_proj = params["w_proj"].astype(f32)      # (Z+R, L)
    b_proj = params["b_proj"].astype(f32)      # (L,)
    w_ih = params["w_ih"].astype(f32)          # (L, 4R)
    w_hh = params["w_hh"].astype(f32)          # (R, 4R)

    # projection Linear folded into LSTM input gates:
    #   gates_x = [z|h] @ (w_proj @ w_ih) + (b_proj @ w_ih + b_ih + b_hh)
    wzh = (w_proj @ w_ih).astype(f32)                                       # (Z+R, 4R)
    b_fused = (b_proj @ w_ih + params["b_ih"] + params["b_hh"]).astype(f32)  # (4R,)

    # pack all small vectors into one lane-dense slab
    vec = jnp.zeros((8, W), f32)
    vec = vec.at[0, :4 * R].set(b_fused)
    vec = vec.at[1, :R].set(params["bn_gamma"].astype(f32))
    vec = vec.at[2, :R].set(params["bn_beta"].astype(f32))
    vec = vec.at[3, :B].set(params["b_out"].astype(f32))
    vec = vec.at[4, :B].set(params["bin_centers"].astype(f32))

    # zero-pad output-head weights to lane-dense width
    w_out_p = jnp.zeros((R, W), f32).at[:, :B].set(params["w_out"].astype(f32))

    prep = {"wzh": wzh, "whh": w_hh, "vec": vec, "w_out_p": w_out_p,
            "Z": Z, "R": R, "B": B, "W": W}
    jax.block_until_ready((wzh, w_hh, vec, w_out_p))
    return prep


def make_critic_forward(prep):
    """Returns a jitted forward(z, h, reward_hidden) closing over prepared weights."""
    f32 = jnp.float32
    R, B, W = prep["R"], prep["B"], prep["W"]
    wzh, whh, vec, w_out_p = prep["wzh"], prep["whh"], prep["vec"], prep["w_out_p"]
    vmem = pl.BlockSpec(memory_space=pltpu.MemorySpace.VMEM)

    @jax.jit
    def forward(z, h, reward_hidden):
        # z: (1, T, Z), h: (1, T, R), reward_hidden: ((1,1,R), (1,1,R))
        zh = jnp.concatenate([z[0], h[0]], axis=-1).astype(f32)              # (T, Z+R)
        state0 = jnp.concatenate([reward_hidden[0][0],
                                  reward_hidden[1][0]], axis=0).astype(f32)  # (2, R)
        T = zh.shape[0]

        probs_p, misc = pl.pallas_call(
            _critic_kernel,
            out_shape=(jax.ShapeDtypeStruct((T, W), f32),
                       jax.ShapeDtypeStruct((8, W), f32)),
            in_specs=[vmem] * 6,
            out_specs=(vmem, vmem),
        )(zh, state0, wzh, whh, vec, w_out_p)

        vt = misc[0, :B]                      # (B,)
        vt_probs = probs_p[:, :B]             # (T, B)
        h_n = misc[1:2, :R][None]             # (1, 1, R)
        c_n = misc[2:3, :R][None]             # (1, 1, R)
        return vt, vt_probs, (h_n, c_n)

    return forward


def symexp(x):
    return jnp.sign(x) * (jnp.exp(jnp.abs(x)) - 1.0)


def make_params(key, num_codes, num_latent, recurrent_size, latent_dim,
                bin_min, bin_max, bin_numbers):
    Z = num_codes * num_latent
    ks = jax.random.split(key, 8)
    scale = 0.1
    f32 = jnp.float32
    # NOTE: the PyTorch module zero-inits Linear/LSTM weights; deterministic random
    # weights are used here so the kernel exercises real compute (synthetic init).
    return {
        "w_proj": scale * jax.random.normal(ks[0], (Z + recurrent_size, latent_dim), f32),
        "b_proj": scale * jax.random.normal(ks[1], (latent_dim,), f32),
        "w_ih":   scale * jax.random.normal(ks[2], (latent_dim, 4 * recurrent_size), f32),
        "w_hh":   scale * jax.random.normal(ks[3], (recurrent_size, 4 * recurrent_size), f32),
        "b_ih":   scale * jax.random.normal(ks[4], (4 * recurrent_size,), f32),
        "b_hh":   scale * jax.random.normal(ks[5], (4 * recurrent_size,), f32),
        "bn_gamma": jnp.ones((recurrent_size,), f32),
        "bn_beta":  jnp.zeros((recurrent_size,), f32),
        "w_out":  scale * jax.random.normal(ks[6], (recurrent_size, bin_numbers), f32),
        "b_out":  scale * jax.random.normal(ks[7], (bin_numbers,), f32),
        "bin_centers": symexp(jnp.linspace(bin_min, bin_max, bin_numbers)).astype(f32),
    }


if __name__ == "__main__":
    # Small, self-consistent shapes
    num_codes, num_latent = 4, 8          # Z = 32
    recurrent_size = 32
    latent_dim = 32
    bin_numbers = 16
    bin_min, bin_max = -5.0, 5.0
    T = 8                                 # sequence length (batch = 1)

    key = jax.random.PRNGKey(0)
    k_p, k_z, k_h, k_h0, k_c0 = jax.random.split(key, 5)

    params = make_params(k_p, num_codes, num_latent, recurrent_size,
                         latent_dim, bin_min, bin_max, bin_numbers)

    # --- one-time host-side folding (hoisted out of the forward path) ---
    prep = prepare_critic_params(params, num_codes, num_latent, recurrent_size)
    critic_forward = make_critic_forward(prep)

    z = jax.random.normal(k_z, (1, T, num_codes * num_latent), jnp.float32)
    h = jax.random.normal(k_h, (1, T, recurrent_size), jnp.float32)
    reward_hidden = (
        jax.random.normal(k_h0, (1, 1, recurrent_size), jnp.float32),
        jax.random.normal(k_c0, (1, 1, recurrent_size), jnp.float32),
    )

    vt, vt_probs, new_hidden = critic_forward(z, h, reward_hidden)
    jax.block_until_ready((vt, vt_probs, new_hidden))

    assert vt.shape == (bin_numbers,)
    assert vt_probs.shape == (T, bin_numbers)
    assert new_hidden[0].shape == (1, 1, recurrent_size)
    assert new_hidden[1].shape == (1, 1, recurrent_size)
    # softmax over dim 0 -> each bin-column of vt_probs sums to ~1 (exact division)
    assert jnp.allclose(jnp.sum(vt_probs, axis=0), 1.0, atol=1e-4)
    assert bool(jnp.all(jnp.isfinite(vt))) and bool(jnp.all(jnp.isfinite(vt_probs)))
    assert bool(jnp.all(jnp.isfinite(new_hidden[0]))) and bool(jnp.all(jnp.isfinite(new_hidden[1])))

    print("KERNEL_OK")
</pallas_src>

<mosaic_0001>
module attributes {stable_mosaic.version = 11 : i64} {
  func.func @_critic_kernel(%arg0: memref<8x64xf32, #tpu.memory_space<vmem>>, %arg1: memref<2x32xf32, #tpu.memory_space<vmem>>, %arg2: memref<64x128xf32, #tpu.memory_space<vmem>>, %arg3: memref<32x128xf32, #tpu.memory_space<vmem>>, %arg4: memref<8x128xf32, #tpu.memory_space<vmem>>, %arg5: memref<32x128xf32, #tpu.memory_space<vmem>>, %arg6: memref<8x128xf32, #tpu.memory_space<vmem>>, %arg7: memref<8x128xf32, #tpu.memory_space<vmem>>) attributes {dimension_semantics = [], scalar_prefetch = 0 : i64, scratch_operands = 0 : i64, tpu.core_type = #tpu.core_type<tc>} {
    %c0 = arith.constant 0 : index
    %c0_0 = arith.constant 0 : index
    %0 = vector.load %arg4[%c0, %c0_0] : memref<8x128xf32, #tpu.memory_space<vmem>>, vector<1x128xf32>
    %c1 = arith.constant 1 : index
    %c0_1 = arith.constant 0 : index
    %1 = vector.load %arg4[%c1, %c0_1] : memref<8x128xf32, #tpu.memory_space<vmem>>, vector<1x32xf32>
    %c2 = arith.constant 2 : index
    %c0_2 = arith.constant 0 : index
    %2 = vector.load %arg4[%c2, %c0_2] : memref<8x128xf32, #tpu.memory_space<vmem>>, vector<1x32xf32>
    %c3 = arith.constant 3 : index
    %c0_3 = arith.constant 0 : index
    %3 = vector.load %arg4[%c3, %c0_3] : memref<8x128xf32, #tpu.memory_space<vmem>>, vector<1x128xf32>
    %c4 = arith.constant 4 : index
    %c0_4 = arith.constant 0 : index
    %4 = vector.load %arg4[%c4, %c0_4] : memref<8x128xf32, #tpu.memory_space<vmem>>, vector<1x128xf32>
    %c0_5 = arith.constant 0 : index
    %c0_6 = arith.constant 0 : index
    %5 = vector.load %arg0[%c0_5, %c0_6] : memref<8x64xf32, #tpu.memory_space<vmem>>, vector<8x64xf32>
    %c0_7 = arith.constant 0 : index
    %c0_8 = arith.constant 0 : index
    %6 = vector.load %arg2[%c0_7, %c0_8] : memref<64x128xf32, #tpu.memory_space<vmem>>, vector<64x128xf32>
    %cst = arith.constant dense<0.000000e+00> : vector<8x128xf32>
    %7 = tpu.matmul %5, %6, %cst {dimension_numbers = #tpu.dot_dimension_numbers<[1], [0], [0], [1], [0, 0, 1, 1], [], []>} : vector<8x64xf32>, vector<64x128xf32>, vector<8x128xf32> -> vector<8x128xf32>
    %8 = vector.broadcast %0 : vector<1x128xf32> to vector<8x128xf32>
    %9 = arith.addf %7, %8 : vector<8x128xf32>
    %c0_9 = arith.constant 0 : index
    %c0_10 = arith.constant 0 : index
    %10 = vector.load %arg3[%c0_9, %c0_10] : memref<32x128xf32, #tpu.memory_space<vmem>>, vector<32x128xf32>
    %11 = tpu.iota {dimensions = array<i32: 1>} : vector<1x128xi32>
    %c64_i32 = arith.constant 64 : i32
    %12 = vector.broadcast %c64_i32 : i32 to vector<1x128xi32>
    %13 = arith.cmpi sge, %11, %12 : vector<1x128xi32>
    %c96_i32 = arith.constant 96 : i32
    %14 = vector.broadcast %c96_i32 : i32 to vector<1x128xi32>
    %15 = arith.cmpi slt, %11, %14 : vector<1x128xi32>
    %16 = arith.andi %13, %15 : vector<1x128xi1>
    %c0_11 = arith.constant 0 : index
    %c0_12 = arith.constant 0 : index
    %17 = vector.load %arg1[%c0_11, %c0_12] : memref<2x32xf32, #tpu.memory_space<vmem>>, vector<1x32xf32>
    %c1_13 = arith.constant 1 : index
    %c0_14 = arith.constant 0 : index
    %18 = vector.load %arg1[%c1_13, %c0_14] : memref<2x32xf32, #tpu.memory_space<vmem>>, vector<1x32xf32>
    %19 = vector.extract_strided_slice %9 {offsets = [0, 0], sizes = [1, 128], strides = [1, 1]} : vector<8x128xf32> to vector<1x128xf32>
    %cst_15 = arith.constant dense<0.000000e+00> : vector<1x128xf32>
    %20 = tpu.matmul %17, %10, %cst_15 {dimension_numbers = #tpu.dot_dimension_numbers<[1], [0], [0], [1], [0, 0, 1, 1], [], []>} : vector<1x32xf32>, vector<32x128xf32>, vector<1x128xf32> -> vector<1x128xf32>
    %21 = arith.addf %19, %20 : vector<1x128xf32>
    %22 = math.tanh %21 : vector<1x128xf32>
    %23 = arith.negf %21 : vector<1x128xf32>
    %24 = math.exp %23 : vector<1x128xf32>
    %cst_16 = arith.constant 1.000000e+00 : f32
    %25 = vector.broadcast %cst_16 : f32 to vector<1x128xf32>
    %26 = arith.addf %25, %24 : vector<1x128xf32>
    %27 = arith.divf %25, %26 : vector<1x128xf32>
    %28 = arith.select %16, %22, %27 : vector<1x128xi1>, vector<1x128xf32>
    %29 = vector.extract_strided_slice %28 {offsets = [0, 0], sizes = [1, 32], strides = [1, 1]} : vector<1x128xf32> to vector<1x32xf32>
    %30 = vector.extract_strided_slice %28 {offsets = [0, 32], sizes = [1, 32], strides = [1, 1]} : vector<1x128xf32> to vector<1x32xf32>
    %31 = vector.extract_strided_slice %28 {offsets = [0, 64], sizes = [1, 32], strides = [1, 1]} : vector<1x128xf32> to vector<1x32xf32>
    %32 = vector.extract_strided_slice %28 {offsets = [0, 96], sizes = [1, 32], strides = [1, 1]} : vector<1x128xf32> to vector<1x32xf32>
    %33 = arith.mulf %30, %18 : vector<1x32xf32>
    %34 = arith.mulf %29, %31 : vector<1x32xf32>
    %35 = arith.addf %33, %34 : vector<1x32xf32>
    %36 = math.tanh %35 : vector<1x32xf32>
    %37 = arith.mulf %32, %36 : vector<1x32xf32>
    %38 = vector.extract_strided_slice %9 {offsets = [1, 0], sizes = [1, 128], strides = [1, 1]} : vector<8x128xf32> to vector<1x128xf32>
    %cst_17 = arith.constant dense<0.000000e+00> : vector<1x128xf32>
    %39 = tpu.matmul %37, %10, %cst_17 {dimension_numbers = #tpu.dot_dimension_numbers<[1], [0], [0], [1], [0, 0, 1, 1], [], []>} : vector<1x32xf32>, vector<32x128xf32>, vector<1x128xf32> -> vector<1x128xf32>
    %40 = arith.addf %38, %39 : vector<1x128xf32>
    %41 = math.tanh %40 : vector<1x128xf32>
    %42 = arith.negf %40 : vector<1x128xf32>
    %43 = math.exp %42 : vector<1x128xf32>
    %cst_18 = arith.constant 1.000000e+00 : f32
    %44 = vector.broadcast %cst_18 : f32 to vector<1x128xf32>
    %45 = arith.addf %44, %43 : vector<1x128xf32>
    %46 = arith.divf %44, %45 : vector<1x128xf32>
    %47 = arith.select %16, %41, %46 : vector<1x128xi1>, vector<1x128xf32>
    %48 = vector.extract_strided_slice %47 {offsets = [0, 0], sizes = [1, 32], strides = [1, 1]} : vector<1x128xf32> to vector<1x32xf32>
    %49 = vector.extract_strided_slice %47 {offsets = [0, 32], sizes = [1, 32], strides = [1, 1]} : vector<1x128xf32> to vector<1x32xf32>
    %50 = vector.extract_strided_slice %47 {offsets = [0, 64], sizes = [1, 32], strides = [1, 1]} : vector<1x128xf32> to vector<1x32xf32>
    %51 = vector.extract_strided_slice %47 {offsets = [0, 96], sizes = [1, 32], strides = [1, 1]} : vector<1x128xf32> to vector<1x32xf32>
    %52 = arith.mulf %49, %35 : vector<1x32xf32>
    %53 = arith.mulf %48, %50 : vector<1x32xf32>
    %54 = arith.addf %52, %53 : vector<1x32xf32>
    %55 = math.tanh %54 : vector<1x32xf32>
    %56 = arith.mulf %51, %55 : vector<1x32xf32>
    %57 = vector.extract_strided_slice %9 {offsets = [2, 0], sizes = [1, 128], strides = [1, 1]} : vector<8x128xf32> to vector<1x128xf32>
    %cst_19 = arith.constant dense<0.000000e+00> : vector<1x128xf32>
    %58 = tpu.matmul %56, %10, %cst_19 {dimension_numbers = #tpu.dot_dimension_numbers<[1], [0], [0], [1], [0, 0, 1, 1], [], []>} : vector<1x32xf32>, vector<32x128xf32>, vector<1x128xf32> -> vector<1x128xf32>
    %59 = arith.addf %57, %58 : vector<1x128xf32>
    %60 = math.tanh %59 : vector<1x128xf32>
    %61 = arith.negf %59 : vector<1x128xf32>
    %62 = math.exp %61 : vector<1x128xf32>
    %cst_20 = arith.constant 1.000000e+00 : f32
    %63 = vector.broadcast %cst_20 : f32 to vector<1x128xf32>
    %64 = arith.addf %63, %62 : vector<1x128xf32>
    %65 = arith.divf %63, %64 : vector<1x128xf32>
    %66 = arith.select %16, %60, %65 : vector<1x128xi1>, vector<1x128xf32>
    %67 = vector.extract_strided_slice %66 {offsets = [0, 0], sizes = [1, 32], strides = [1, 1]} : vector<1x128xf32> to vector<1x32xf32>
    %68 = vector.extract_strided_slice %66 {offsets = [0, 32], sizes = [1, 32], strides = [1, 1]} : vector<1x128xf32> to vector<1x32xf32>
    %69 = vector.extract_strided_slice %66 {offsets = [0, 64], sizes = [1, 32], strides = [1, 1]} : vector<1x128xf32> to vector<1x32xf32>
    %70 = vector.extract_strided_slice %66 {offsets = [0, 96], sizes = [1, 32], strides = [1, 1]} : vector<1x128xf32> to vector<1x32xf32>
    %71 = arith.mulf %68, %54 : vector<1x32xf32>
    %72 = arith.mulf %67, %69 : vector<1x32xf32>
    %73 = arith.addf %71, %72 : vector<1x32xf32>
    %74 = math.tanh %73 : vector<1x32xf32>
    %75 = arith.mulf %70, %74 : vector<1x32xf32>
    %76 = vector.extract_strided_slice %9 {offsets = [3, 0], sizes = [1, 128], strides = [1, 1]} : vector<8x128xf32> to vector<1x128xf32>
    %cst_21 = arith.constant dense<0.000000e+00> : vector<1x128xf32>
    %77 = tpu.matmul %75, %10, %cst_21 {dimension_numbers = #tpu.dot_dimension_numbers<[1], [0], [0], [1], [0, 0, 1, 1], [], []>} : vector<1x32xf32>, vector<32x128xf32>, vector<1x128xf32> -> vector<1x128xf32>
    %78 = arith.addf %76, %77 : vector<1x128xf32>
    %79 = math.tanh %78 : vector<1x128xf32>
    %80 = arith.negf %78 : vector<1x128xf32>
    %81 = math.exp %80 : vector<1x128xf32>
    %cst_22 = arith.constant 1.000000e+00 : f32
    %82 = vector.broadcast %cst_22 : f32 to vector<1x128xf32>
    %83 = arith.addf %82, %81 : vector<1x128xf32>
    %84 = arith.divf %82, %83 : vector<1x128xf32>
    %85 = arith.select %16, %79, %84 : vector<1x128xi1>, vector<1x128xf32>
    %86 = vector.extract_strided_slice %85 {offsets = [0, 0], sizes = [1, 32], strides = [1, 1]} : vector<1x128xf32> to vector<1x32xf32>
    %87 = vector.extract_strided_slice %85 {offsets = [0, 32], sizes = [1, 32], strides = [1, 1]} : vector<1x128xf32> to vector<1x32xf32>
    %88 = vector.extract_strided_slice %85 {offsets = [0, 64], sizes = [1, 32], strides = [1, 1]} : vector<1x128xf32> to vector<1x32xf32>
    %89 = vector.extract_strided_slice %85 {offsets = [0, 96], sizes = [1, 32], strides = [1, 1]} : vector<1x128xf32> to vector<1x32xf32>
    %90 = arith.mulf %87, %73 : vector<1x32xf32>
    %91 = arith.mulf %86, %88 : vector<1x32xf32>
    %92 = arith.addf %90, %91 : vector<1x32xf32>
    %93 = math.tanh %92 : vector<1x32xf32>
    %94 = arith.mulf %89, %93 : vector<1x32xf32>
    %95 = vector.extract_strided_slice %9 {offsets = [4, 0], sizes = [1, 128], strides = [1, 1]} : vector<8x128xf32> to vector<1x128xf32>
    %cst_23 = arith.constant dense<0.000000e+00> : vector<1x128xf32>
    %96 = tpu.matmul %94, %10, %cst_23 {dimension_numbers = #tpu.dot_dimension_numbers<[1], [0], [0], [1], [0, 0, 1, 1], [], []>} : vector<1x32xf32>, vector<32x128xf32>, vector<1x128xf32> -> vector<1x128xf32>
    %97 = arith.addf %95, %96 : vector<1x128xf32>
    %98 = math.tanh %97 : vector<1x128xf32>
    %99 = arith.negf %97 : vector<1x128xf32>
    %100 = math.exp %99 : vector<1x128xf32>
    %cst_24 = arith.constant 1.000000e+00 : f32
    %101 = vector.broadcast %cst_24 : f32 to vector<1x128xf32>
    %102 = arith.addf %101, %100 : vector<1x128xf32>
    %103 = arith.divf %101, %102 : vector<1x128xf32>
    %104 = arith.select %16, %98, %103 : vector<1x128xi1>, vector<1x128xf32>
    %105 = vector.extract_strided_slice %104 {offsets = [0, 0], sizes = [1, 32], strides = [1, 1]} : vector<1x128xf32> to vector<1x32xf32>
    %106 = vector.extract_strided_slice %104 {offsets = [0, 32], sizes = [1, 32], strides = [1, 1]} : vector<1x128xf32> to vector<1x32xf32>
    %107 = vector.extract_strided_slice %104 {offsets = [0, 64], sizes = [1, 32], strides = [1, 1]} : vector<1x128xf32> to vector<1x32xf32>
    %108 = vector.extract_strided_slice %104 {offsets = [0, 96], sizes = [1, 32], strides = [1, 1]} : vector<1x128xf32> to vector<1x32xf32>
    %109 = arith.mulf %106, %92 : vector<1x32xf32>
    %110 = arith.mulf %105, %107 : vector<1x32xf32>
    %111 = arith.addf %109, %110 : vector<1x32xf32>
    %112 = math.tanh %111 : vector<1x32xf32>
    %113 = arith.mulf %108, %112 : vector<1x32xf32>
    %114 = vector.extract_strided_slice %9 {offsets = [5, 0], sizes = [1, 128], strides = [1, 1]} : vector<8x128xf32> to vector<1x128xf32>
    %cst_25 = arith.constant dense<0.000000e+00> : vector<1x128xf32>
    %115 = tpu.matmul %113, %10, %cst_25 {dimension_numbers = #tpu.dot_dimension_numbers<[1], [0], [0], [1], [0, 0, 1, 1], [], []>} : vector<1x32xf32>, vector<32x128xf32>, vector<1x128xf32> -> vector<1x128xf32>
    %116 = arith.addf %114, %115 : vector<1x128xf32>
    %117 = math.tanh %116 : vector<1x128xf32>
    %118 = arith.negf %116 : vector<1x128xf32>
    %119 = math.exp %118 : vector<1x128xf32>
    %cst_26 = arith.constant 1.000000e+00 : f32
    %120 = vector.broadcast %cst_26 : f32 to vector<1x128xf32>
    %121 = arith.addf %120, %119 : vector<1x128xf32>
    %122 = arith.divf %120, %121 : vector<1x128xf32>
    %123 = arith.select %16, %117, %122 : vector<1x128xi1>, vector<1x128xf32>
    %124 = vector.extract_strided_slice %123 {offsets = [0, 0], sizes = [1, 32], strides = [1, 1]} : vector<1x128xf32> to vector<1x32xf32>
    %125 = vector.extract_strided_slice %123 {offsets = [0, 32], sizes = [1, 32], strides = [1, 1]} : vector<1x128xf32> to vector<1x32xf32>
    %126 = vector.extract_strided_slice %123 {offsets = [0, 64], sizes = [1, 32], strides = [1, 1]} : vector<1x128xf32> to vector<1x32xf32>
    %127 = vector.extract_strided_slice %123 {offsets = [0, 96], sizes = [1, 32], strides = [1, 1]} : vector<1x128xf32> to vector<1x32xf32>
    %128 = arith.mulf %125, %111 : vector<1x32xf32>
    %129 = arith.mulf %124, %126 : vector<1x32xf32>
    %130 = arith.addf %128, %129 : vector<1x32xf32>
    %131 = math.tanh %130 : vector<1x32xf32>
    %132 = arith.mulf %127, %131 : vector<1x32xf32>
    %133 = vector.extract_strided_slice %9 {offsets = [6, 0], sizes = [1, 128], strides = [1, 1]} : vector<8x128xf32> to vector<1x128xf32>
    %cst_27 = arith.constant dense<0.000000e+00> : vector<1x128xf32>
    %134 = tpu.matmul %132, %10, %cst_27 {dimension_numbers = #tpu.dot_dimension_numbers<[1], [0], [0], [1], [0, 0, 1, 1], [], []>} : vector<1x32xf32>, vector<32x128xf32>, vector<1x128xf32> -> vector<1x128xf32>
    %135 = arith.addf %133, %134 : vector<1x128xf32>
    %136 = math.tanh %135 : vector<1x128xf32>
    %137 = arith.negf %135 : vector<1x128xf32>
    %138 = math.exp %137 : vector<1x128xf32>
    %cst_28 = arith.constant 1.000000e+00 : f32
    %139 = vector.broadcast %cst_28 : f32 to vector<1x128xf32>
    %140 = arith.addf %139, %138 : vector<1x128xf32>
    %141 = arith.divf %139, %140 : vector<1x128xf32>
    %142 = arith.select %16, %136, %141 : vector<1x128xi1>, vector<1x128xf32>
    %143 = vector.extract_strided_slice %142 {offsets = [0, 0], sizes = [1, 32], strides = [1, 1]} : vector<1x128xf32> to vector<1x32xf32>
    %144 = vector.extract_strided_slice %142 {offsets = [0, 32], sizes = [1, 32], strides = [1, 1]} : vector<1x128xf32> to vector<1x32xf32>
    %145 = vector.extract_strided_slice %142 {offsets = [0, 64], sizes = [1, 32], strides = [1, 1]} : vector<1x128xf32> to vector<1x32xf32>
    %146 = vector.extract_strided_slice %142 {offsets = [0, 96], sizes = [1, 32], strides = [1, 1]} : vector<1x128xf32> to vector<1x32xf32>
    %147 = arith.mulf %144, %130 : vector<1x32xf32>
    %148 = arith.mulf %143, %145 : vector<1x32xf32>
    %149 = arith.addf %147, %148 : vector<1x32xf32>
    %150 = math.tanh %149 : vector<1x32xf32>
    %151 = arith.mulf %146, %150 : vector<1x32xf32>
    %152 = vector.extract_strided_slice %9 {offsets = [7, 0], sizes = [1, 128], strides = [1, 1]} : vector<8x128xf32> to vector<1x128xf32>
    %cst_29 = arith.constant dense<0.000000e+00> : vector<1x128xf32>
    %153 = tpu.matmul %151, %10, %cst_29 {dimension_numbers = #tpu.dot_dimension_numbers<[1], [0], [0], [1], [0, 0, 1, 1], [], []>} : vector<1x32xf32>, vector<32x128xf32>, vector<1x128xf32> -> vector<1x128xf32>
    %154 = arith.addf %152, %153 : vector<1x128xf32>
    %155 = math.tanh %154 : vector<1x128xf32>
    %156 = arith.negf %154 : vector<1x128xf32>
    %157 = math.exp %156 : vector<1x128xf32>
    %cst_30 = arith.constant 1.000000e+00 : f32
    %158 = vector.broadcast %cst_30 : f32 to vector<1x128xf32>
    %159 = arith.addf %158, %157 : vector<1x128xf32>
    %160 = arith.divf %158, %159 : vector<1x128xf32>
    %161 = arith.select %16, %155, %160 : vector<1x128xi1>, vector<1x128xf32>
    %162 = vector.extract_strided_slice %161 {offsets = [0, 0], sizes = [1, 32], strides = [1, 1]} : vector<1x128xf32> to vector<1x32xf32>
    %163 = vector.extract_strided_slice %161 {offsets = [0, 32], sizes = [1, 32], strides = [1, 1]} : vector<1x128xf32> to vector<1x32xf32>
    %164 = vector.extract_strided_slice %161 {offsets = [0, 64], sizes = [1, 32], strides = [1, 1]} : vector<1x128xf32> to vector<1x32xf32>
    %165 = vector.extract_strided_slice %161 {offsets = [0, 96], sizes = [1, 32], strides = [1, 1]} : vector<1x128xf32> to vector<1x32xf32>
    %166 = arith.mulf %163, %149 : vector<1x32xf32>
    %167 = arith.mulf %162, %164 : vector<1x32xf32>
    %168 = arith.addf %166, %167 : vector<1x32xf32>
    %169 = math.tanh %168 : vector<1x32xf32>
    %170 = arith.mulf %165, %169 : vector<1x32xf32>
    %171 = tpu.concatenate %37, %56, %75, %94, %113, %132, %151, %170 in 0 : vector<1x32xf32>, vector<1x32xf32>, vector<1x32xf32>, vector<1x32xf32>, vector<1x32xf32>, vector<1x32xf32>, vector<1x32xf32>, vector<1x32xf32> -> vector<8x32xf32>
    %cst_31 = arith.constant dense<0.000000e+00> : vector<32xf32>
    %172 = vector.multi_reduction <add>, %171, %cst_31 [0] : vector<8x32xf32> to vector<32xf32>
    %173 = vector.shape_cast %172 : vector<32xf32> to vector<1x32xf32>
    %cst_32 = arith.constant 8.000000e+00 : f32
    %174 = vector.broadcast %cst_32 : f32 to vector<1x32xf32>
    %175 = arith.divf %173, %174 : vector<1x32xf32>
    %176 = vector.broadcast %175 : vector<1x32xf32> to vector<8x32xf32>
    %177 = arith.subf %171, %176 : vector<8x32xf32>
    %178 = arith.mulf %177, %177 : vector<8x32xf32>
    %cst_33 = arith.constant dense<0.000000e+00> : vector<32xf32>
    %179 = vector.multi_reduction <add>, %178, %cst_33 [0] : vector<8x32xf32> to vector<32xf32>
    %180 = vector.shape_cast %179 : vector<32xf32> to vector<1x32xf32>
    %cst_34 = arith.constant 8.000000e+00 : f32
    %181 = vector.broadcast %cst_34 : f32 to vector<1x32xf32>
    %182 = arith.divf %180, %181 : vector<1x32xf32>
    %183 = vector.broadcast %175 : vector<1x32xf32> to vector<8x32xf32>
    %184 = arith.subf %171, %183 : vector<8x32xf32>
    %cst_35 = arith.constant 9.99999974E-6 : f32
    %185 = vector.broadcast %cst_35 : f32 to vector<1x32xf32>
    %186 = arith.addf %182, %185 : vector<1x32xf32>
    %187 = math.rsqrt %186 : vector<1x32xf32>
    %188 = vector.broadcast %187 : vector<1x32xf32> to vector<8x32xf32>
    %189 = arith.mulf %184, %188 : vector<8x32xf32>
    %190 = vector.broadcast %1 : vector<1x32xf32> to vector<8x32xf32>
    %191 = arith.mulf %189, %190 : vector<8x32xf32>
    %192 = vector.broadcast %2 : vector<1x32xf32> to vector<8x32xf32>
    %193 = arith.addf %191, %192 : vector<8x32xf32>
    %cst_36 = arith.constant 0.000000e+00 : f32
    %194 = vector.broadcast %cst_36 : f32 to vector<8x32xf32>
    %195 = arith.maximumf %193, %194 : vector<8x32xf32>
    %c0_37 = arith.constant 0 : index
    %c0_38 = arith.constant 0 : index
    %196 = vector.load %arg5[%c0_37, %c0_38] : memref<32x128xf32, #tpu.memory_space<vmem>>, vector<32x128xf32>
    %cst_39 = arith.constant dense<0.000000e+00> : vector<8x128xf32>
    %197 = tpu.matmul %195, %196, %cst_39 {dimension_numbers = #tpu.dot_dimension_numbers<[1], [0], [0], [1], [0, 0, 1, 1], [], []>} : vector<8x32xf32>, vector<32x128xf32>, vector<8x128xf32> -> vector<8x128xf32>
    %198 = vector.broadcast %3 : vector<1x128xf32> to vector<8x128xf32>
    %199 = arith.addf %197, %198 : vector<8x128xf32>
    %cst_40 = arith.constant dense<0xFF800000> : vector<128xf32>
    %200 = vector.multi_reduction <maximumf>, %199, %cst_40 [0] : vector<8x128xf32> to vector<128xf32>
    %201 = vector.shape_cast %200 : vector<128xf32> to vector<1x128xf32>
    %202 = vector.broadcast %201 : vector<1x128xf32> to vector<8x128xf32>
    %203 = arith.subf %199, %202 : vector<8x128xf32>
    %204 = math.exp %203 : vector<8x128xf32>
    %cst_41 = arith.constant dense<0.000000e+00> : vector<128xf32>
    %205 = vector.multi_reduction <add>, %204, %cst_41 [0] : vector<8x128xf32> to vector<128xf32>
    %206 = vector.shape_cast %205 : vector<128xf32> to vector<1x128xf32>
    %207 = vector.broadcast %206 : vector<1x128xf32> to vector<8x128xf32>
    %208 = arith.divf %204, %207 : vector<8x128xf32>
    %c0_42 = arith.constant 0 : index
    %c0_43 = arith.constant 0 : index
    %209 = vector.load %arg6[%c0_42, %c0_43] : memref<8x128xf32, #tpu.memory_space<vmem>>, vector<8x128xf32>
    tpu.vector_store %arg6[%c0_42, %c0_43], %208 {strides = array<i32>} : memref<8x128xf32, #tpu.memory_space<vmem>>, vector<8x128xf32>,
    %210 = vector.broadcast %4 : vector<1x128xf32> to vector<8x128xf32>
    %211 = arith.mulf %208, %210 : vector<8x128xf32>
    %cst_44 = arith.constant dense<0.000000e+00> : vector<128xf32>
    %212 = vector.multi_reduction <add>, %211, %cst_44 [0] : vector<8x128xf32> to vector<128xf32>
    %213 = vector.shape_cast %212 : vector<128xf32> to vector<1x128xf32>
    %cst_45 = arith.constant 0.000000e+00 : f32
    %214 = vector.broadcast %cst_45 : f32 to vector<1x96xf32>
    %215 = tpu.concatenate %170, %214 in 1 : vector<1x32xf32>, vector<1x96xf32> -> vector<1x128xf32>
    %216 = tpu.concatenate %168, %214 in 1 : vector<1x32xf32>, vector<1x96xf32> -> vector<1x128xf32>
    %cst_46 = arith.constant 0.000000e+00 : f32
    %217 = vector.broadcast %cst_46 : f32 to vector<5x128xf32>
    %218 = tpu.concatenate %213, %215, %216, %217 in 0 : vector<1x128xf32>, vector<1x128xf32>, vector<1x128xf32>, vector<5x128xf32> -> vector<8x128xf32>
    %c0_47 = arith.constant 0 : index
    %c0_48 = arith.constant 0 : index
    %219 = vector.load %arg7[%c0_47, %c0_48] : memref<8x128xf32, #tpu.memory_space<vmem>>, vector<8x128xf32>
    tpu.vector_store %arg7[%c0_47, %c0_48], %218 {strides = array<i32>} : memref<8x128xf32, #tpu.memory_space<vmem>>, vector<8x128xf32>,
    return
  }
}

</mosaic_0001>

<bundles_post_ra>
// kernel: forward.1
= control target key start
LH: loop header
LB: loop body
LE: loop exit
PB: predicated region body
PF: predicated region fallthrough
CT: control target
= control target key end

     0   :  { %13 = vsyncpa [#allocation3], 0  ;;  %s1855_s0 = inlined_call_operand.vmem [shape: f32[8,64], index: 0, kind: input, shape index: {}]   ;;  %s1856_s1 = inlined_call_operand.vmem [shape: f32[2,32], index: 1, kind: input, shape index: {}]   ;;  %s1857_s2 = inlined_call_operand.hbm [shape: f32[64,128], index: 2, kind: input, shape index: {}]   ;;  %s1858_s3 = inlined_call_operand.hbm [shape: f32[32,128], index: 3, kind: input, shape index: {}]   ;;  %s1859_s4 = inlined_call_operand.vmem [shape: f32[8,128], index: 4, kind: input, shape index: {}]   ;;  %s1860_s5 = inlined_call_operand.vmem [shape: f32[32,128], index: 5, kind: input, shape index: {}]   ;;  %s1861_s6 = inlined_call_operand.hbm [shape: f32[8,128], index: 6, kind: output, shape index: {0}]   ;;  %s1862_s7 = inlined_call_operand.vmem [shape: f32[8,128], index: 7, kind: output, shape index: {1}]  }
   0x1   :  { %14 = vsyncpa [#allocation6], 0 }
   0x2   :  { %15 = vsyncpa [#allocation4], 0  ;;  %s1565_s24 = smov [#allocation2]  }
   0x3   :  { %s25_s25 = sshll.u32 %s1565_s24, 4  ;;  %s26_s25 = int_to_ptr.vmem [resolvable:$true] %s25_s25 }
   0x4   :  { %s1507_s26 = scalar_lea.vmem %s26_s25, 1024  ;;  %p1512_p1 = scmp.lt.s32.totalorder %s26_s25, %s26_s25 }
   0x5   :  { %p1508_p0 = scmp.ne.s32.totalorder %s26_s25, %s1507_s26  ;;  %p1513_p2 = scmp.lt.s32.totalorder %s1507_s26, %s1507_s26 }
   0x7   :  { %p1514_p3 = por %p1513_p2, %p1512_p1 }
   0x9   :  { %p1515_p4 = pnand %p1514_p3, %p1508_p0 }
   0xb   :  { %1518 = shalt.err (!%p1515_p4)
}
   0xc   :  { %s1566_s27 = smov 128   ;;  %s1567_s28 = smov 8  }
   0xd   :  { %31 = dma.hbm_to_vmem [thread:$0]  %s1857_s2, 1024, %s26_s25, [#allocation3], %s1566_s27, %s1566_s27, %s1567_s28  }
   0xe   :  { %s1568_s8 = smov [#allocation5]  }
   0xf   :  { %s37_s9 = sshll.u32 %s1568_s8, 4  ;;  %s38_s9 = int_to_ptr.vmem [resolvable:$true] %s37_s9 }
  0x10   :  { %s1527_s10 = scalar_lea.vmem %s38_s9, 512  ;;  %p1532_p6 = scmp.lt.s32.totalorder %s38_s9, %s38_s9 }
  0x11   :  { %p1528_p5 = scmp.ne.s32.totalorder %s38_s9, %s1527_s10  ;;  %p1533_p7 = scmp.lt.s32.totalorder %s1527_s10, %s1527_s10 }
  0x13   :  { %p1534_p8 = por %p1533_p7, %p1532_p6 }
  0x15   :  { %p1535_p9 = pnand %p1534_p8, %p1528_p5 }
  0x17   :  { %1538 = shalt.err (!%p1535_p9)
}
  0x18   :  { %43 = dma.hbm_to_vmem [thread:$0]  %s1858_s3, 512, %s38_s9, [#allocation6], %s1566_s27, %s1566_s27, %s1567_s28  }
  0x19   :  { %1559 = dma.done.wait [#allocation3], 1024  }
  0x1a   :  { %1560 = vsyncadd [#allocation3], 4294966272 }
  0x1b   :  { %1561 = dma.done.wait [#allocation6], 512  }
  0x1c   :  { %1562 = vsyncadd [#allocation6], 4294966784  ;;  %v1569_v0 = vmov 0.0   ;;  %vm1570_vm0 = vmmov 0   ;;  %v67_v1 = vld [vmem:[#allocation2 + $0x38] sm:$0xff]  ;;  %v66_v2 = vld [vmem:[#allocation2 + $0x30] sm:$0xff]  ;;  %v150_v25 = vlaneseq }
  0x1d   :  { %1301 = vmatprep.subr.mxu0 %v1569_v0  ;;  %1320 = vmatprep.subr.mxu1 %v1569_v0  ;;  %v1627_v3 = vld [vmem:[#allocation5 + $0x18] sm:$0xff]  ;;  %v65_v4 = vld [vmem:[#allocation2 + $0x28] sm:$0xff]  ;;  %v1631_v5 = vld [vmem:[#allocation5 + $0x10] sm:$0xff]  ;;  %vm157_vm1 = vcmask 261120   ;;  %vm72_vm2 = vcmask 523264   ;;  %s1571_s16 = smov 64  }
  0x1e   :  { %1317 = vmatprep.mubr.msk.f32.mxu0 %vm1570_vm0, %v1569_v0  ;;  %1328 = vmatprep.mubr.msk.f32.mxu1 %vm1570_vm0, %v1569_v0  ;;  %v1634_v6 = vld [vmem:[#allocation5 + $0x8] sm:$0xff]  ;;  %v64_v7 = vld [vmem:[#allocation2 + $0x20] sm:$0xff]  ;;  %v63_v9 = vld [vmem:[#allocation2 + $0x18] sm:$0xff]  ;;  %v151_v26 = vand.u32 127, %v150_v25  ;;  %s1572_s19 = smov 32   ;;  %vm1016_vm6 = vcmask 1040384  }
  0x1f   :  { %1302 = vmatpush3.msra.mxu0 %v67_v1  ;;  %1321 = vmatpush3.msra.mxu1 %v1627_v3  ;;  %v1639_v8 = vld [vmem:[#allocation5] sm:$0xff]  ;;  %v62_v11 = vld [vmem:[#allocation2 + $0x10] sm:$0xff]  ;;  %v61_v12 = vld [vmem:[#allocation2 + $0x8] sm:$0xff]  ;;  %vm1018_vm7 = vcmask 1041408   ;;  %vm1020_vm8 = vcmask 1042432   ;;  %vm1022_vm9 = vcmask 1043456  }
  0x20   :  { %1303 = vmatprep.subr.mxu0 %v1569_v0  ;;  %1322 = vmatprep.subr.mxu1 %v1569_v0  ;;  %v155_v10 = vld [vmem:[%s1856_s1] sm:$0x1]  ;;  %vm152_vm3 = vcmp.ge.s32.totalorder %v151_v26, 64  ;;  %vm153_vm4 = vcmp.lt.s32.totalorder %v151_v26, 96  ;;  %v156_v31 = vld [vmem:[%s1856_s1 + $0x1] sm:$0x1] }
  0x21   :  { %1304 = vmatpush3.msra.mxu0 %v66_v2  ;;  %1323 = vmatpush3.msra.mxu1 %v1631_v5  ;;  %v60_v13 = vld [vmem:[#allocation2] sm:$0xff]  ;;  %vm1684_vm5 = vmand %vm152_vm3, %vm153_vm4  ;;  %vm1024_vm10 = vcmask 1044480   ;;  %vm1026_vm11 = vcmask 1045504   ;;  %s1573_s21 = smov 96   ;;  %vm1028_vm12 = vcmask 1046528   ;;  %vm1030_vm13 = vcmask 1048320  }
  0x22   :  { %1305 = vmatprep.subr.mxu0 %v1569_v0  ;;  %1324 = vmatprep.subr.mxu1 %v1569_v0  ;;  %v59_v14 = vld [vmem:[%s1855_s0] sm:$0xff]  ;;  %s1574_s10 = smov [#allocation7]  }
  0x23   :  { %1306 = vmatpush3.msra.mxu0 %v65_v4  ;;  %1325 = vmatpush3.msra.mxu1 %v1634_v6  ;;  %v1224_v17 = vld [vmem:[%s1859_s4] ss:$0 sm:$0xff]  ;;  %s1210_s11 = sshll.u32 %s1574_s10, 4  ;;  %s1211_s11 = int_to_ptr.vmem [resolvable:$true] %s1210_s11 }
  0x24   :  { %1307 = vmatprep.subr.mxu0 %v1569_v0  ;;  %1326 = vmatprep.subr.mxu1 %v1569_v0  ;;  %s1539_s3 = scalar_lea.vmem %s1211_s11, 128  ;;  %p1544_p11 = scmp.lt.s32.totalorder %s1211_s11, %s1211_s11 }
  0x25   :  { %1308 = vmatpush3.msra.mxu0 %v64_v7  ;;  %1327 = vmatpush3.msra.mxu1 %v1639_v8  ;;  %p1540_p10 = scmp.ne.s32.totalorder %s1211_s11, %s1539_s3  ;;  %p1545_p12 = scmp.lt.s32.totalorder %s1539_s3, %s1539_s3 }
  0x26   :  { %1309 = vmatprep.subr.mxu0 %v1569_v0  ;;  %1329 = vmatmul.mubr.msk.f32.vlgmr.msra.gmra.mxu1 %vm157_vm1, %v155_v10 }
  0x27   :  { %1310 = vmatpush3.msra.mxu0 %v63_v9  ;;  %1331 = vmatprep.subr.mxu1 %v1569_v0  ;;  %p1546_p13 = por %p1545_p12, %p1544_p11 }
  0x28   :  { %1311 = vmatprep.subr.mxu0 %v1569_v0  ;;  %1332 = vmatpush3.msra.mxu1 %v1627_v3 }
  0x29   :  { %1312 = vmatpush3.msra.mxu0 %v62_v11  ;;  %1333 = vmatprep.subr.mxu1 %v1569_v0  ;;  %p1547_p0 = pnand %p1546_p13, %p1540_p10 }
  0x2a   :  { %1313 = vmatprep.subr.mxu0 %v1569_v0  ;;  %1334 = vmatpush3.msra.mxu1 %v1631_v5 }
  0x2b   :  { %1314 = vmatpush3.msra.mxu0 %v61_v12  ;;  %1335 = vmatprep.subr.mxu1 %v1569_v0 }
  0x2c   :  { %1315 = vmatprep.subr.mxu0 %v1569_v0  ;;  %1336 = vmatpush3.msra.mxu1 %v1634_v6 }
  0x2d   :  { %1316 = vmatpush3.msra.mxu0 %v60_v13  ;;  %1337 = vmatprep.subr.mxu1 %v1569_v0 }
  0x2e   :  { %1318 = vmatmul.mubr.msk.f32.vlgmr.msra.gmra.mxu0 %vm72_vm2, %v59_v14  ;;  %1338 = vmatpush3.msra.mxu1 %v1639_v8 }
  0x2f   :  { %1339 = vmatprep.mubr.msk.f32.mxu1 %vm1570_vm0, %v1569_v0  ;;  %1342 = vmatprep.subr.mxu0 %v1569_v0 }
  0x30   :  { %1350 = vmatprep.mubr.msk.f32.mxu0 %vm1570_vm0, %v1569_v0  ;;  %1343 = vmatpush3.msra.mxu0 %v1627_v3 }
  0x31   :  { %1353 = vmatprep.subr.mxu1 %v1569_v0  ;;  %1344 = vmatprep.subr.mxu0 %v1569_v0 }
  0x32   :  { %1345 = vmatpush3.msra.mxu0 %v1631_v5 }
  0x33   :  { %1346 = vmatprep.subr.mxu0 %v1569_v0 }
  0x34   :  { %1347 = vmatpush3.msra.mxu0 %v1634_v6 }
  0x35   :  { %1348 = vmatprep.subr.mxu0 %v1569_v0 }
  0x36   :  { %1349 = vmatpush3.msra.mxu0 %v1639_v8 }
  0x37   :  { %1364 = vmatprep.subr.mxu0 %v1569_v0 }
  0xe6   :  { %v227_v15 = vpop.f32.mrf.mxu1 }
  0xe8   :  { %v1330_v16 = vpop.f32.mrf.mxu1 }
  0xee   :  { %v142_v18 = vpop.f32.mrf.mxu0 }
  0xef   :  { %v1681_v19 = vadd.f32 %v1224_v17, %v142_v18 }
  0xf0   :  { %v1319_v20 = vpop.f32.mrf.mxu0 }
  0xf1   :  { %v231_v21 = vadd.f32 %v227_v15, %v1681_v19 }
  0xf3   :  { %v1227_v22 = vmul.f32 -1.442695, %v231_v21 }
  0xf5   :  { %1429 = vpow2.f32 %v1227_v22 }
  0xf6   :  { %1431 = vtanh.f32 %v231_v21 }
 0x102   :  { %v1430_v23 = vpop.eup %1429 }
 0x103   :  { %v236_v24 = vadd.f32 1.0, %v1430_v23  ;;  %v1432_v28 = vpop.eup %1431 }
 0x105   :  { %1433 = vrcp.f32 %v236_v24 }
 0x112   :  { %v1434_v29 = vpop.eup %1433 }
 0x113   :  { %v239_v30 = vsel %vm1684_vm5, %v1432_v28, %v1434_v29 }
 0x114   :  { %246 = vrot.lane.b32.xlu0 %v239_v30, %s1571_s16 }
 0x118   :  { %241 = vrot.lane.b32.xlu0 %v156_v31, %s1572_s19 }
 0x186   :  { %v247_v32 = vpop.permute.xlu0 %246 }
 0x187   :  { %v249_v33 = vmul.f32 %v247_v32, %v239_v30 }
 0x189   :  { %251 = vrot.lane.b32.xlu1 %v249_v33, %s1572_s19 }
 0x18a   :  { %v242_v34 = vpop.permute.xlu0 %241 }
 0x18b   :  { %v244_v35 = vmul.f32 %v242_v34, %v239_v30 }
 0x1fb   :  { %v252_v36 = vpop.permute.xlu1 %251 }
 0x1fc   :  { %v254_v37 = vadd.f32 %v252_v36, %v244_v35 }
 0x1fe   :  { %1435 = vtanh.f32 %v254_v37  ;;  %v349_v54 = vrot.slane %v254_v37, 7 }
 0x20b   :  { %v1436_v38 = vpop.eup %1435 }
 0x20c   :  { %257 = vrot.lane.b32.xlu1 %v1436_v38, %s1571_s16 }
 0x27e   :  { %v258_v39 = vpop.permute.xlu1 %257 }
 0x27f   :  { %v1697_v40 = vmul.f32 %v258_v39, %v239_v30 }
 0x281   :  { %262 = vrot.lane.b32.xlu0 %v1697_v40, %s1572_s19 }
 0x2f3   :  { %v263_v41 = vpop.permute.xlu0 %262 }
 0x2f4   :  { %1340 = vmatmul.mubr.msk.f32.vlgmr.msra.gmra.mxu1 %vm157_vm1, %v263_v41 }
 0x2f5   :  { %1354 = vmatpush3.msra.mxu1 %v1627_v3  ;;  %1361 = vmatprep.mubr.msk.f32.mxu1 %vm1570_vm0, %v1569_v0 }
 0x2f6   :  { %1355 = vmatprep.subr.mxu1 %v1569_v0 }
 0x2f7   :  { %1356 = vmatpush3.msra.mxu1 %v1631_v5 }
 0x2f8   :  { %1357 = vmatprep.subr.mxu1 %v1569_v0 }
 0x2f9   :  { %1358 = vmatpush3.msra.mxu1 %v1634_v6 }
 0x2fa   :  { %1359 = vmatprep.subr.mxu1 %v1569_v0 }
 0x2fb   :  { %1360 = vmatpush3.msra.mxu1 %v1639_v8 }
 0x2fc   :  { %1375 = vmatprep.subr.mxu1 %v1569_v0 }
 0x3b4   :  { %v332_v42 = vpop.f32.mrf.mxu1 }
 0x3b5   :  { %v337_v43 = vrot.slane %v332_v42, 7 }
 0x3b6   :  { %v1341_v44 = vpop.f32.mrf.mxu1 }
 0x3b7   :  { %v339_v45 = vadd.f32 %v337_v43, %v1681_v19 }
 0x3b9   :  { %v1229_v46 = vmul.f32 -1.442695, %v339_v45 }
 0x3bb   :  { %1437 = vpow2.f32 %v1229_v46 }
 0x3bc   :  { %1439 = vtanh.f32 %v339_v45 }
 0x3c8   :  { %v1438_v47 = vpop.eup %1437 }
 0x3c9   :  { %v344_v48 = vadd.f32 1.0, %v1438_v47  ;;  %v1440_v49 = vpop.eup %1439 }
 0x3cb   :  { %1441 = vrcp.f32 %v344_v48 }
 0x3d8   :  { %v1442_v50 = vpop.eup %1441 }
 0x3d9   :  { %v347_v51 = vsel %vm1684_vm5, %v1440_v49, %v1442_v50 }
 0x3da   :  { %353 = vrot.lane.b32.xlu1 %v347_v51, %s1571_s16  ;;  %v351_v55 = vmul.f32 %v349_v54, %v347_v51 }
 0x44c   :  { %v354_v52 = vpop.permute.xlu1 %353 }
 0x44d   :  { %v356_v53 = vmul.f32 %v354_v52, %v347_v51 }
 0x44f   :  { %358 = vrot.lane.b32.xlu0 %v356_v53, %s1572_s19 }
 0x4c1   :  { %v359_v56 = vpop.permute.xlu0 %358 }
 0x4c2   :  { %v361_v57 = vadd.f32 %v359_v56, %v351_v55 }
 0x4c4   :  { %1443 = vtanh.f32 %v361_v57  ;;  %v457_v16 = vrot.slane %v361_v57, 7 }
 0x4d1   :  { %v1444_v58 = vpop.eup %1443 }
 0x4d2   :  { %364 = vrot.lane.b32.xlu1 %v1444_v58, %s1571_s16 }
 0x544   :  { %v365_v59 = vpop.permute.xlu1 %364 }
 0x545   :  { %v367_v60 = vmul.f32 %v365_v59, %v347_v51 }
 0x547   :  { %v369_v61 = vrot.slane %v367_v60, 1  ;;  %v1017_v24 = vsel %vm1016_vm6, %v1697_v40, %v367_v60 }
 0x549   :  { %370 = vrot.lane.b32.xlu0 %v369_v61, %s1572_s19 }
 0x5bb   :  { %v371_v62 = vpop.permute.xlu0 %370 }
 0x5bc   :  { %1351 = vmatmul.mubr.msk.f32.vlgmr.msra.gmra.mxu0 %vm157_vm1, %v371_v62 }
 0x5bd   :  { %1365 = vmatpush3.msra.mxu0 %v1627_v3  ;;  %1372 = vmatprep.mubr.msk.f32.mxu0 %vm1570_vm0, %v1569_v0 }
 0x5be   :  { %1366 = vmatprep.subr.mxu0 %v1569_v0 }
 0x5bf   :  { %1367 = vmatpush3.msra.mxu0 %v1631_v5 }
 0x5c0   :  { %1368 = vmatprep.subr.mxu0 %v1569_v0 }
 0x5c1   :  { %1369 = vmatpush3.msra.mxu0 %v1634_v6 }
 0x5c2   :  { %1370 = vmatprep.subr.mxu0 %v1569_v0 }
 0x5c3   :  { %1371 = vmatpush3.msra.mxu0 %v1639_v8 }
 0x5c4   :  { %1386 = vmatprep.subr.mxu0 %v1569_v0 }
 0x67c   :  { %v440_v63 = vpop.f32.mrf.mxu0 }
 0x67d   :  { %v445_v1 = vrot.slane %v440_v63, 6 }
 0x67e   :  { %v1352_v2 = vpop.f32.mrf.mxu0 }
 0x67f   :  { %v447_v4 = vadd.f32 %v445_v1, %v1681_v19 }
 0x681   :  { %v1231_v7 = vmul.f32 -1.442695, %v447_v4 }
 0x683   :  { %1445 = vpow2.f32 %v1231_v7 }
 0x684   :  { %1447 = vtanh.f32 %v447_v4 }
 0x690   :  { %v1446_v9 = vpop.eup %1445 }
 0x691   :  { %v452_v10 = vadd.f32 1.0, %v1446_v9  ;;  %v1448_v11 = vpop.eup %1447 }
 0x693   :  { %1449 = vrcp.f32 %v452_v10 }
 0x6a0   :  { %v1450_v12 = vpop.eup %1449 }
 0x6a1   :  { %v455_v13 = vsel %vm1684_vm5, %v1448_v11, %v1450_v12 }
 0x6a2   :  { %461 = vrot.lane.b32.xlu1 %v455_v13, %s1571_s16  ;;  %v459_v17 = vmul.f32 %v457_v16, %v455_v13 }
 0x714   :  { %v462_v14 = vpop.permute.xlu1 %461 }
 0x715   :  { %v464_v15 = vmul.f32 %v462_v14, %v455_v13 }
 0x717   :  { %466 = vrot.lane.b32.xlu0 %v464_v15, %s1572_s19 }
 0x789   :  { %v467_v18 = vpop.permute.xlu0 %466 }
 0x78a   :  { %v469_v20 = vadd.f32 %v467_v18, %v459_v17 }
 0x78c   :  { %1451 = vtanh.f32 %v469_v20  ;;  %v565_v41 = vrot.slane %v469_v20, 7 }
 0x799   :  { %v1452_v21 = vpop.eup %1451 }
 0x79a   :  { %472 = vrot.lane.b32.xlu1 %v1452_v21, %s1571_s16 }
 0x80c   :  { %v473_v22 = vpop.permute.xlu1 %472 }
 0x80d   :  { %v475_v23 = vmul.f32 %v473_v22, %v455_v13 }
 0x80f   :  { %v477_v25 = vrot.slane %v475_v23, 2  ;;  %v1019_v26 = vsel %vm1018_vm7, %v1017_v24, %v475_v23 }
 0x811   :  { %478 = vrot.lane.b32.xlu0 %v477_v25, %s1572_s19 }
 0x883   :  { %v479_v28 = vpop.permute.xlu0 %478 }
 0x884   :  { %1362 = vmatmul.mubr.msk.f32.vlgmr.msra.gmra.mxu1 %vm157_vm1, %v479_v28 }
 0x885   :  { %1376 = vmatpush3.msra.mxu1 %v1627_v3  ;;  %1383 = vmatprep.mubr.msk.f32.mxu1 %vm1570_vm0, %v1569_v0 }
 0x886   :  { %1377 = vmatprep.subr.mxu1 %v1569_v0 }
 0x887   :  { %1378 = vmatpush3.msra.mxu1 %v1631_v5 }
 0x888   :  { %1379 = vmatprep.subr.mxu1 %v1569_v0 }
 0x889   :  { %1380 = vmatpush3.msra.mxu1 %v1634_v6 }
 0x88a   :  { %1381 = vmatprep.subr.mxu1 %v1569_v0 }
 0x88b   :  { %1382 = vmatpush3.msra.mxu1 %v1639_v8 }
 0x88c   :  { %1397 = vmatprep.subr.mxu1 %v1569_v0 }
 0x944   :  { %v548_v29 = vpop.f32.mrf.mxu1 }
 0x945   :  { %v553_v30 = vrot.slane %v548_v29, 5 }
 0x946   :  { %v1363_v31 = vpop.f32.mrf.mxu1 }
 0x947   :  { %v555_v32 = vadd.f32 %v553_v30, %v1681_v19 }
 0x949   :  { %v1233_v33 = vmul.f32 -1.442695, %v555_v32 }
 0x94b   :  { %1453 = vpow2.f32 %v1233_v33 }
 0x94c   :  { %1455 = vtanh.f32 %v555_v32 }
 0x958   :  { %v1454_v34 = vpop.eup %1453 }
 0x959   :  { %v560_v35 = vadd.f32 1.0, %v1454_v34  ;;  %v1456_v36 = vpop.eup %1455 }
 0x95b   :  { %1457 = vrcp.f32 %v560_v35 }
 0x968   :  { %v1458_v37 = vpop.eup %1457 }
 0x969   :  { %v563_v38 = vsel %vm1684_vm5, %v1456_v36, %v1458_v37 }
 0x96a   :  { %569 = vrot.lane.b32.xlu1 %v563_v38, %s1571_s16  ;;  %v567_v42 = vmul.f32 %v565_v41, %v563_v38 }
 0x9dc   :  { %v570_v39 = vpop.permute.xlu1 %569 }
 0x9dd   :  { %v572_v40 = vmul.f32 %v570_v39, %v563_v38 }
 0x9df   :  { %574 = vrot.lane.b32.xlu0 %v572_v40, %s1572_s19 }
 0xa51   :  { %v575_v43 = vpop.permute.xlu0 %574 }
 0xa52   :  { %v577_v44 = vadd.f32 %v575_v43, %v567_v42 }
 0xa54   :  { %1459 = vtanh.f32 %v577_v44  ;;  %v673_v63 = vrot.slane %v577_v44, 7 }
 0xa61   :  { %v1460_v45 = vpop.eup %1459 }
 0xa62   :  { %580 = vrot.lane.b32.xlu1 %v1460_v45, %s1571_s16 }
 0xad4   :  { %v581_v46 = vpop.permute.xlu1 %580 }
 0xad5   :  { %v583_v47 = vmul.f32 %v581_v46, %v563_v38 }
 0xad7   :  { %v585_v48 = vrot.slane %v583_v47, 3  ;;  %v1021_v49 = vsel %vm1020_vm8, %v1019_v26, %v583_v47 }
 0xad9   :  { %586 = vrot.lane.b32.xlu0 %v585_v48, %s1572_s19 }
 0xb4b   :  { %v587_v50 = vpop.permute.xlu0 %586 }
 0xb4c   :  { %1373 = vmatmul.mubr.msk.f32.vlgmr.msra.gmra.mxu0 %vm157_vm1, %v587_v50 }
 0xb4d   :  { %1387 = vmatpush3.msra.mxu0 %v1627_v3  ;;  %1394 = vmatprep.mubr.msk.f32.mxu0 %vm1570_vm0, %v1569_v0 }
 0xb4e   :  { %1388 = vmatprep.subr.mxu0 %v1569_v0 }
 0xb4f   :  { %1389 = vmatpush3.msra.mxu0 %v1631_v5 }
 0xb50   :  { %1390 = vmatprep.subr.mxu0 %v1569_v0 }
 0xb51   :  { %1391 = vmatpush3.msra.mxu0 %v1634_v6 }
 0xb52   :  { %1392 = vmatprep.subr.mxu0 %v1569_v0 }
 0xb53   :  { %1393 = vmatpush3.msra.mxu0 %v1639_v8 }
 0xb54   :  { %1408 = vmatprep.subr.mxu0 %v1569_v0 }
 0xc0c   :  { %v656_v51 = vpop.f32.mrf.mxu0 }
 0xc0d   :  { %v661_v52 = vrot.slane %v656_v51, 4 }
 0xc0e   :  { %v1374_v53 = vpop.f32.mrf.mxu0 }
 0xc0f   :  { %v663_v54 = vadd.f32 %v661_v52, %v1681_v19 }
 0xc11   :  { %v1235_v55 = vmul.f32 -1.442695, %v663_v54 }
 0xc13   :  { %1461 = vpow2.f32 %v1235_v55 }
 0xc14   :  { %1463 = vtanh.f32 %v663_v54 }
 0xc20   :  { %v1462_v56 = vpop.eup %1461 }
 0xc21   :  { %v668_v57 = vadd.f32 1.0, %v1462_v56  ;;  %v1464_v58 = vpop.eup %1463 }
 0xc23   :  { %1465 = vrcp.f32 %v668_v57 }
 0xc30   :  { %v1466_v59 = vpop.eup %1465 }
 0xc31   :  { %v671_v60 = vsel %vm1684_vm5, %v1464_v58, %v1466_v59 }
 0xc32   :  { %677 = vrot.lane.b32.xlu1 %v671_v60, %s1571_s16  ;;  %v675_v1 = vmul.f32 %v673_v63, %v671_v60 }
 0xca4   :  { %v678_v61 = vpop.permute.xlu1 %677 }
 0xca5   :  { %v680_v62 = vmul.f32 %v678_v61, %v671_v60 }
 0xca7   :  { %682 = vrot.lane.b32.xlu0 %v680_v62, %s1572_s19 }
 0xd19   :  { %v683_v2 = vpop.permute.xlu0 %682 }
 0xd1a   :  { %v685_v4 = vadd.f32 %v683_v2, %v675_v1 }
 0xd1c   :  { %1467 = vtanh.f32 %v685_v4  ;;  %v781_v23 = vrot.slane %v685_v4, 7 }
 0xd29   :  { %v1468_v7 = vpop.eup %1467 }
 0xd2a   :  { %688 = vrot.lane.b32.xlu1 %v1468_v7, %s1571_s16 }
 0xd9c   :  { %v689_v9 = vpop.permute.xlu1 %688 }
 0xd9d   :  { %v691_v10 = vmul.f32 %v689_v9, %v671_v60 }
 0xd9f   :  { %v693_v11 = vrot.slane %v691_v10, 4  ;;  %v1023_v12 = vsel %vm1022_vm9, %v1021_v49, %v691_v10 }
 0xda1   :  { %694 = vrot.lane.b32.xlu0 %v693_v11, %s1572_s19 }
 0xe13   :  { %v695_v13 = vpop.permute.xlu0 %694 }
 0xe14   :  { %1384 = vmatmul.mubr.msk.f32.vlgmr.msra.gmra.mxu1 %vm157_vm1, %v695_v13  ;;  %v1243_v13 = vld [vmem:[%s1859_s4 + $0x2] ss:$0 sm:$0xff] }
 0xe15   :  { %1398 = vmatpush3.msra.mxu1 %v1627_v3  ;;  %1405 = vmatprep.mubr.msk.f32.mxu1 %vm1570_vm0, %v1569_v0 }
 0xe16   :  { %1399 = vmatprep.subr.mxu1 %v1569_v0 }
 0xe17   :  { %1400 = vmatpush3.msra.mxu1 %v1631_v5 }
 0xe18   :  { %1401 = vmatprep.subr.mxu1 %v1569_v0 }
 0xe19   :  { %1402 = vmatpush3.msra.mxu1 %v1634_v6 }
 0xe1a   :  { %1403 = vmatprep.subr.mxu1 %v1569_v0 }
 0xe1b   :  { %1404 = vmatpush3.msra.mxu1 %v1639_v8 }
 0xed4   :  { %v764_v14 = vpop.f32.mrf.mxu1 }
 0xed5   :  { %v769_v15 = vrot.slane %v764_v14, 3  ;;  %v1075_v14 = vld [vmem:[%s1860_s5 + $0x18] sm:$0xff] }
 0xed6   :  { %v1385_v16 = vpop.f32.mrf.mxu1 }
 0xed7   :  { %v771_v3 = vadd.f32 %v769_v15, %v1681_v19  ;;  %v1074_v15 = vld [vmem:[%s1860_s5 + $0x10] sm:$0xff]  ;;  %v1073_v16 = vld [vmem:[%s1860_s5 + $0x8] sm:$0xff] }
 0xed9   :  { %v1237_v17 = vmul.f32 -1.442695, %v771_v3 }
 0xedb   :  { %1469 = vpow2.f32 %v1237_v17 }
 0xedc   :  { %1471 = vtanh.f32 %v771_v3  ;;  %v1072_v3 = vld [vmem:[%s1860_s5] sm:$0xff] }
 0xee8   :  { %v1470_v18 = vpop.eup %1469 }
 0xee9   :  { %v776_v20 = vadd.f32 1.0, %v1470_v18  ;;  %v1472_v5 = vpop.eup %1471 }
 0xeeb   :  { %1473 = vrcp.f32 %v776_v20 }
 0xef8   :  { %v1474_v21 = vpop.eup %1473 }
 0xef9   :  { %v779_v6 = vsel %vm1684_vm5, %v1472_v5, %v1474_v21 }
 0xefa   :  { %785 = vrot.lane.b32.xlu1 %v779_v6, %s1571_s16  ;;  %v783_v24 = vmul.f32 %v781_v23, %v779_v6 }
 0xf6c   :  { %v786_v22 = vpop.permute.xlu1 %785 }
 0xf6d   :  { %v788_v8 = vmul.f32 %v786_v22, %v779_v6 }
 0xf6f   :  { %790 = vrot.lane.b32.xlu0 %v788_v8, %s1572_s19 }
 0xfe1   :  { %v791_v25 = vpop.permute.xlu0 %790 }
 0xfe2   :  { %v793_v26 = vadd.f32 %v791_v25, %v783_v24 }
 0xfe4   :  { %1475 = vtanh.f32 %v793_v26  ;;  %v889_v46 = vrot.slane %v793_v26, 7 }
 0xff1   :  { %v1476_v28 = vpop.eup %1475 }
 0xff2   :  { %796 = vrot.lane.b32.xlu1 %v1476_v28, %s1571_s16 }
0x1064   :  { %v797_v29 = vpop.permute.xlu1 %796 }
0x1065   :  { %v799_v30 = vmul.f32 %v797_v29, %v779_v6 }
0x1067   :  { %v801_v31 = vrot.slane %v799_v30, 5  ;;  %v1025_v32 = vsel %vm1024_vm10, %v1023_v12, %v799_v30 }
0x1069   :  { %802 = vrot.lane.b32.xlu0 %v801_v31, %s1572_s19 }
0x10db   :  { %v803_v33 = vpop.permute.xlu0 %802 }
0x10dc   :  { %1395 = vmatmul.mubr.msk.f32.vlgmr.msra.gmra.mxu0 %vm157_vm1, %v803_v33 }
0x10dd   :  { %1416 = vmatprep.mubr.msk.f32.mxu0 %vm1570_vm0, %v1569_v0  ;;  %1409 = vmatpush3.msra.mxu0 %v1075_v14 }
0x10de   :  { %1410 = vmatprep.subr.mxu0 %v1569_v0 }
0x10df   :  { %1411 = vmatpush3.msra.mxu0 %v1074_v15 }
0x10e0   :  { %1412 = vmatprep.subr.mxu0 %v1569_v0 }
0x10e1   :  { %1413 = vmatpush3.msra.mxu0 %v1073_v16 }
0x10e2   :  { %1414 = vmatprep.subr.mxu0 %v1569_v0 }
0x10e3   :  { %1415 = vmatpush3.msra.mxu0 %v1072_v3 }
0x119c   :  { %v872_v34 = vpop.f32.mrf.mxu0 }
0x119d   :  { %v877_v35 = vrot.slane %v872_v34, 2 }
0x119e   :  { %v1396_v36 = vpop.f32.mrf.mxu0 }
0x119f   :  { %v879_v37 = vadd.f32 %v877_v35, %v1681_v19 }
0x11a1   :  { %v1239_v38 = vmul.f32 -1.442695, %v879_v37 }
0x11a3   :  { %1477 = vpow2.f32 %v1239_v38 }
0x11a4   :  { %1479 = vtanh.f32 %v879_v37 }
0x11b0   :  { %v1478_v39 = vpop.eup %1477 }
0x11b1   :  { %v884_v40 = vadd.f32 1.0, %v1478_v39  ;;  %v1480_v41 = vpop.eup %1479 }
0x11b3   :  { %1481 = vrcp.f32 %v884_v40 }
0x11c0   :  { %v1482_v42 = vpop.eup %1481 }
0x11c1   :  { %v887_v43 = vsel %vm1684_vm5, %v1480_v41, %v1482_v42 }
0x11c2   :  { %893 = vrot.lane.b32.xlu1 %v887_v43, %s1571_s16  ;;  %v891_v47 = vmul.f32 %v889_v46, %v887_v43 }
0x1234   :  { %v894_v44 = vpop.permute.xlu1 %893 }
0x1235   :  { %v896_v45 = vmul.f32 %v894_v44, %v887_v43 }
0x1237   :  { %898 = vrot.lane.b32.xlu0 %v896_v45, %s1572_s19  ;;  %v1244_v45 = vld [vmem:[%s1859_s4 + $0x3] ss:$0 sm:$0xff] }
0x12a9   :  { %v899_v48 = vpop.permute.xlu0 %898 }
0x12aa   :  { %v901_v49 = vadd.f32 %v899_v48, %v891_v47 }
0x12ac   :  { %1483 = vtanh.f32 %v901_v49  ;;  %v997_v9 = vrot.slane %v901_v49, 7 }
0x12b9   :  { %v1484_v50 = vpop.eup %1483 }
0x12ba   :  { %904 = vrot.lane.b32.xlu1 %v1484_v50, %s1571_s16 }
0x132c   :  { %v905_v51 = vpop.permute.xlu1 %904 }
0x132d   :  { %v907_v52 = vmul.f32 %v905_v51, %v887_v43 }
0x132f   :  { %v909_v53 = vrot.slane %v907_v52, 6  ;;  %v1027_v54 = vsel %vm1026_vm11, %v1025_v32, %v907_v52 }
0x1331   :  { %910 = vrot.lane.b32.xlu0 %v909_v53, %s1572_s19 }
0x13a3   :  { %v911_v55 = vpop.permute.xlu0 %910 }
0x13a4   :  { %1406 = vmatmul.mubr.msk.f32.vlgmr.msra.gmra.mxu1 %vm157_vm1, %v911_v55 }
0x1464   :  { %v980_v56 = vpop.f32.mrf.mxu1 }
0x1465   :  { %v985_v57 = vrot.slane %v980_v56, 1 }
0x1466   :  { %v1407_v58 = vpop.f32.mrf.mxu1 }
0x1467   :  { %v987_v59 = vadd.f32 %v985_v57, %v1681_v19  ;;  %v1242_v19 = vld [vmem:[%s1859_s4 + $0x1] ss:$0 sm:$0xff] }
0x1469   :  { %v1241_v60 = vmul.f32 -1.442695, %v987_v59 }
0x146b   :  { %1485 = vpow2.f32 %v1241_v60 }
0x146c   :  { %1487 = vtanh.f32 %v987_v59 }
0x1478   :  { %v1486_v61 = vpop.eup %1485 }
0x1479   :  { %v992_v62 = vadd.f32 1.0, %v1486_v61  ;;  %v1488_v63 = vpop.eup %1487 }
0x147b   :  { %1489 = vrcp.f32 %v992_v62 }
0x1488   :  { %v1490_v1 = vpop.eup %1489 }
0x1489   :  { %v995_v2 = vsel %vm1684_vm5, %v1488_v63, %v1490_v1 }
0x148a   :  { %1001 = vrot.lane.b32.xlu1 %v995_v2, %s1571_s16  ;;  %v999_v10 = vmul.f32 %v997_v9, %v995_v2 }
0x14fc   :  { %v1002_v4 = vpop.permute.xlu1 %1001 }
0x14fd   :  { %v1004_v7 = vmul.f32 %v1002_v4, %v995_v2 }
0x14ff   :  { %1006 = vrot.lane.b32.xlu0 %v1004_v7, %s1572_s19 }
0x1503   :  { %1058 = vrot.lane.b32.xlu0 %v1242_v19, %s1573_s21 }
0x1571   :  { %v1007_v11 = vpop.permute.xlu0 %1006 }
0x1572   :  { %v1009_v12 = vadd.f32 %v1007_v11, %v999_v10 }
0x1574   :  { %1491 = vtanh.f32 %v1009_v12 }
0x1575   :  { %v1059_v38 = vpop.permute.xlu0 %1058 }
0x1581   :  { %v1492_v27 = vpop.eup %1491 }
0x1582   :  { %1012 = vrot.lane.b32.xlu1 %v1492_v27, %s1571_s16 }
0x1586   :  { %1067 = vrot.lane.b32.xlu1 %v1243_v13, %s1573_s21 }
0x15f4   :  { %v1013_v17 = vpop.permute.xlu1 %1012 }
0x15f5   :  { %v1015_v18 = vmul.f32 %v1013_v17, %v995_v2  ;;  %v1246_v2 = vld [vmem:[%s1859_s4 + $0x4] ss:$0 sm:$0xff] }
0x15f7   :  { %v1029_v20 = vsel %vm1028_vm12, %v1027_v54, %v1015_v18  ;;  %1185 = vrot.lane.b32.xlu1 %v1015_v18, %s1572_s19 }
0x15f8   :  { %v1031_v5 = vsel %vm1030_vm13, %v1029_v20, 0.0  ;;  %v1068_v40 = vpop.permute.xlu1 %1067 }
0x15f9   :  { %v1032_v21 = vrot.slane %v1031_v5, 4 }
0x15fb   :  { %v1033_v6 = vadd.f32 %v1032_v21, %v1031_v5 }
0x15fd   :  { %v1034_v22 = vrot.slane %v1033_v6, 2 }
0x15ff   :  { %v1035_v8 = vadd.f32 %v1034_v22, %v1033_v6 }
0x1601   :  { %v1036_v23 = vrot.slane %v1035_v8, 1 }
0x1603   :  { %v1037_v24 = vadd.f32 %v1036_v23, %v1035_v8 }
0x1605   :  { %v1039_v25 = vmul.f32 0.125, %v1037_v24 }
0x1607   :  { %v1040_v26 = vsub.f32 %v1029_v20, %v1039_v25 }
0x1609   :  { %v1041_v28 = vmul.f32 %v1040_v26, %v1040_v26 }
0x160b   :  { %v1042_v29 = vsel %vm1030_vm13, %v1041_v28, 0.0 }
0x160c   :  { %v1043_v0 = vrot.slane %v1042_v29, 4 }
0x160e   :  { %v1044_v30 = vadd.f32 %v1043_v0, %v1042_v29 }
0x1610   :  { %v1045_v31 = vrot.slane %v1044_v30, 2 }
0x1612   :  { %v1046_v32 = vadd.f32 %v1045_v31, %v1044_v30 }
0x1614   :  { %v1047_v33 = vrot.slane %v1046_v32, 1 }
0x1616   :  { %v1048_v34 = vadd.f32 %v1047_v33, %v1046_v32 }
0x1618   :  { %v1049_v35 = vmul.f32 0.125, %v1048_v34 }
0x161a   :  { %v1050_v36 = vadd.f32 1e-05, %v1049_v35 }
0x161c   :  { %1493 = vrsqrt.f32 %v1050_v36 }
0x1629   :  { %v1494_v37 = vpop.eup %1493 }
0x162a   :  { %v1052_v39 = vmul.f32 %v1494_v37, %v1040_v26 }
0x162c   :  { %v1061_v41 = vmul.f32 %v1059_v38, %v1052_v39 }
0x162e   :  { %v1070_v42 = vadd.f32 %v1068_v40, %v1061_v41 }
0x1630   :  { %v1071_v43 = vmax.f32 %v1070_v42, 0.0 }
0x1632   :  { %1081 = vrot.lane.b32.xlu0 %v1071_v43, %s1572_s19 }
0x1636   :  { %1190 = vrot.lane.b32.xlu0 %v1009_v12, %s1573_s21 }
0x16a4   :  { %v1082_v44 = vpop.permute.xlu0 %1081 }
0x16a5   :  { %1417 = vmatmul.mubr.msk.f32.vlgmr.msra.gmra.mxu0 %vm157_vm1, %v1082_v44 }
0x1765   :  { %v1151_v46 = vpop.f32.mrf.mxu0 }
0x1766   :  { %v1152_v47 = vadd.f32 %v1244_v45, %v1151_v46 }
0x1767   :  { %v1418_v48 = vpop.f32.mrf.mxu0 }
0x1768   :  { %v1155_v49 = vrot.slane %v1152_v47, 4 }
0x176a   :  { %v1156_v50 = vmax.f32 %v1152_v47, %v1155_v49 }
0x176c   :  { %v1157_v51 = vrot.slane %v1156_v50, 2 }
0x176e   :  { %v1158_v52 = vmax.f32 %v1156_v50, %v1157_v51 }
0x1770   :  { %v1159_v53 = vrot.slane %v1158_v52, 1 }
0x1772   :  { %v1160_v54 = vmax.f32 %v1158_v52, %v1159_v53 }
0x1774   :  { %v1161_v55 = vsub.f32 %v1152_v47, %v1160_v54 }
0x1776   :  { %v1162_v56 = vmul.f32 1.442695, %v1161_v55 }
0x1778   :  { %1495 = vpow2.f32 %v1162_v56 }
0x1785   :  { %v1496_v57 = vpop.eup %1495 }
0x1786   :  { %v1164_v58 = vrot.slane %v1496_v57, 4 }
0x1788   :  { %v1165_v59 = vadd.f32 %v1496_v57, %v1164_v58 }
0x178a   :  { %v1166_v60 = vrot.slane %v1165_v59, 2 }
0x178c   :  { %v1167_v61 = vadd.f32 %v1166_v60, %v1165_v59 }
0x178e   :  { %v1168_v62 = vrot.slane %v1167_v61, 1 }
0x1790   :  { %v1169_v63 = vadd.f32 %v1168_v62, %v1167_v61 }
0x1792   :  { %1497 = vrcp.f32 %v1169_v63 }
0x179f   :  { %v1498_v1 = vpop.eup %1497 }
0x17a0   :  { %v1171_v4 = vmul.f32 %v1498_v1, %v1496_v57 }
0x17a2   :  { %1172 = vst [vmem:[#allocation7] sm:$0xff] %v1171_v4  ;;  %v1177_v7 = vmul.f32 %v1246_v2, %v1171_v4 }
0x17a3   :  { %1550 = shalt.err (!%p1547_p0)
}
0x17a4   :  { %1213 = dma.vmem_to_hbm [thread:$0]  %s1211_s11, 128, %s1861_s6, [#allocation4]   ;;  %v1178_v19 = vrot.slane %v1177_v7, 4  ;;  %v1186_v10 = vpop.permute.xlu1 %1185  ;;  %v1191_v12 = vpop.permute.xlu0 %1190 }
0x17a5   :  { %v1188_v13 = vsel %vm157_vm1, %v1186_v10, 0.0  ;;  %v1193_v14 = vsel %vm157_vm1, %v1191_v12, 0.0 }
0x17a6   :  { %v1179_v9 = vadd.f32 %v1178_v19, %v1177_v7  ;;  %v1195_v16 = vrot.slane %v1188_v13, 6  ;;  %v1198_v17 = vrot.slane %v1193_v14, 5 }
0x17a8   :  { %v1180_v11 = vrot.slane %v1179_v9, 2 }
0x17aa   :  { %v1181_v27 = vadd.f32 %v1180_v11, %v1179_v9 }
0x17ac   :  { %v1182_v15 = vrot.slane %v1181_v27, 1 }
0x17ae   :  { %v1183_v3 = vadd.f32 %v1182_v15, %v1181_v27 }
0x17b0   :  { %v1200_v18 = vsel %vm1016_vm6, %v1183_v3, %v1195_v16 }
0x17b1   :  { %v1201_v20 = vsel %vm1018_vm7, %v1200_v18, %v1198_v17 }
0x17b2   :  { %v1202_v5 = vsel %vm1020_vm8, %v1201_v20, 0.0 }
0x17b3   :  { %1203 = vst [vmem:[%s1862_s7] sm:$0xff] %v1202_v5 }
0x17b4   :  { %1563 = dma.done.wait [#allocation4], 128  }
0x17b5   :  { %1564 = vsyncadd [#allocation4], 4294967168 }
0x17b6   :  { %1221 = vsyncpa [#allocation3], 1 }
0x17b7   :  { %1222 = vsyncpa [#allocation6], 1 }
0x17b8   :  { %1223 = vsyncpa [#allocation4], 1 }

</bundles_post_ra>
